<compile_context>
chip_gen: v5e
topology: v5e:2x2
jax: 0.10.0
libtpu: 0.0.40
codegen_flags: <defaults>
</compile_context>

<pallas_src>
import jax
import jax.numpy as jnp
from jax.experimental import pallas as pl
from jax.experimental.pallas import tpu as pltpu


def _round_up(x, m):
    return (x + m - 1) // m * m


def _weighted_sum_kernel(w_ref, x_ref, o_ref):
    # w_ref: SMEM (M,) f32 softmax-normalized modality weights (scalar reads)
    # x_ref: VMEM (M, TR, L) tile of stacked modality outputs
    # o_ref: VMEM (TR, L) output tile
    num_modalities = x_ref.shape[0]
    # Unrolled scalar-FMA accumulate over the tiny static modality axis; f32 accum,
    # one lane-dense cast-and-store at the end.
    acc = x_ref[0].astype(jnp.float32) * w_ref[0]
    for m in range(1, num_modalities):
        acc = acc + x_ref[m].astype(jnp.float32) * w_ref[m]
    o_ref[...] = acc.astype(o_ref.dtype)


def weighted_sum(weights, outputs_stacked, *, block_rows=None, min_kernel_elems=1 << 16):
    """weights: [M] raw (un-normalized) params; outputs_stacked: [M, B, H].

    Returns [B, H] == sum_i softmax(weights)[i] * outputs_stacked[i].
    """
    M, B, H = outputs_stacked.shape
    N = B * H
    dtype = outputs_stacked.dtype
    itemsize = jnp.dtype(dtype).itemsize

    # Softmax of the M weights once, outside the kernel (cheap; avoids per-step EUP work).
    nw = jax.nn.softmax(weights.astype(jnp.float32), axis=0)  # (M,)

    def _xla_fallback():
        return jnp.einsum(
            "m,mbh->bh", nw, outputs_stacked.astype(jnp.float32)
        ).astype(dtype)

    # Small-shape fallback: kernel launch + per-step pipeline overhead + wrapper
    # reshapes dominate tiny inputs; plain XLA is faster there.
    if N < min_kernel_elems:
        return _xla_fallback()

    # dtype-aware minimum sublane multiple: f32 -> 8, bf16 -> 16, int8/fp8 -> 32.
    sub = 32 // itemsize

    # Pad-free views. Reshape of a contiguous array is free; Pallas clips/masks
    # the boundary block along the tiled (row) axis, so no HBM pad or slice copies.
    if N % 128 == 0:
        lane = 128
        R = N // 128
        x = outputs_stacked.reshape(M, R, 128)      # lane-dense slab view
        out_shape = (R, 128)
    else:
        lane = H                                    # full last dim on the lane axis
        R = B
        x = outputs_stacked                         # native shape, no copy
        out_shape = (B, H)

    lane_p = _round_up(lane, 128)                   # lanes occupied per row in VMEM

    # --- generation-aware tile-row selection ------------------------------------
    try:
        vmem_cap = int(pltpu.get_tpu_info().vmem_capacity_bytes)
    except Exception:
        vmem_cap = 64 << 20                         # conservative (v7x per-TC VMEM)
    vmem_budget = min(vmem_cap // 4, 40 << 20)      # v5e/v6e -> 32-40 MiB, v7x -> 16 MiB

    # Double-buffered VMEM bytes per row of the grid step: 2 * (M inputs + 1 output).
    bytes_per_row = 2 * (M + 1) * lane_p * itemsize
    tr = vmem_budget // bytes_per_row
    if block_rows is not None:
        tr = min(tr, int(block_rows))
    tr = max(sub, (tr // sub) * sub)

    # Keep >= ~4 grid steps so the software pipeline overlaps DMA-in/compute/DMA-out
    # (and >= 2 so both v7x TensorCores get work).
    min_steps = 4
    if R > sub:
        depth_cap = max(sub, _round_up(pl.cdiv(R, min_steps), sub))
        tr = min(tr, depth_cap)
    tr = min(tr, _round_up(R, sub))

    # Prefer an even number of grid steps (balanced split across v7x's 2 TCs).
    steps = pl.cdiv(R, tr)
    if steps > 1 and steps % 2 == 1:
        tr_even = max(sub, _round_up(pl.cdiv(R, steps + 1), sub))
        if tr_even <= tr and pl.cdiv(R, tr_even) % 2 == 0:
            tr = tr_even
            steps = pl.cdiv(R, tr)

    grid = (steps,)

    # Actual double-buffered per-step footprint; raise the scoped VMEM limit to fit.
    block_foot = 2 * (M + 1) * tr * lane_p * itemsize
    if block_foot + (8 << 20) > vmem_cap // 2:
        # Pathologically wide ragged rows: one tile can't sit comfortably in VMEM.
        return _xla_fallback()
    vmem_limit = int(min(vmem_cap // 2, max(32 << 20, block_foot + (8 << 20))))

    out = pl.pallas_call(
        _weighted_sum_kernel,
        out_shape=jax.ShapeDtypeStruct(out_shape, dtype),
        grid_spec=pltpu.PrefetchScalarGridSpec(
            num_scalar_prefetch=0,
            grid=grid,
            in_specs=[
                # Normalized weights live in SMEM; read as scalars inside the kernel.
                pl.BlockSpec(memory_space=pltpu.MemorySpace.SMEM),
                # All M modalities for a (tr, lane) slab of elements.
                pl.BlockSpec((M, tr, lane), lambda i: (0, i, 0)),
            ],
            out_specs=pl.BlockSpec((tr, lane), lambda i: (i, 0)),
        ),
        compiler_params=pltpu.CompilerParams(
            # Single independent axis: shards across the 2 TensorCores on v7x.
            dimension_semantics=(pltpu.PARALLEL,),
            vmem_limit_bytes=vmem_limit,
        ),
        cost_estimate=pl.CostEstimate(
            flops=2 * M * N,
            transcendentals=0,
            bytes_accessed=(M + 1) * N * itemsize,
        ),
    )(nw, x)

    return out.reshape(B, H)


def weighted_sum_ref(weights, outputs_stacked):
    nw = jax.nn.softmax(weights.astype(jnp.float32), axis=0)
    return jnp.sum(nw[:, None, None] * outputs_stacked.astype(jnp.float32), axis=0)


if __name__ == "__main__":
    key = jax.random.PRNGKey(0)
    M = 3        # num_modalities
    B = 64       # batch
    H = 128      # hidden / feature dim

    kw, kx = jax.random.split(key)
    # deterministic "parameter" init (mirrors torch.randn(num_modalities))
    weights = jax.random.normal(kw, (M,), dtype=jnp.float32)
    # stacked modality outputs: [M, B, H]
    outputs_stacked = jax.random.normal(kx, (M, B, H), dtype=jnp.float32)

    # Force the Pallas path even at this small demo size (default threshold would
    # route tiny inputs to the XLA fallback).
    out = jax.block_until_ready(weighted_sum(weights, outputs_stacked, min_kernel_elems=0))
    ref = weighted_sum_ref(weights, outputs_stacked)
    assert out.shape == (B, H)
    assert jnp.allclose(out, ref, atol=1e-5, rtol=1e-5), "mismatch vs reference"

    # Ragged case: B*H not a multiple of 128 -> native (M, B, H) tiling over B,
    # no pad and no output slice; the boundary block is clipped by Pallas.
    B2, H2 = 50, 200
    kx2 = jax.random.fold_in(kx, 1)
    outputs2 = jax.random.normal(kx2, (M, B2, H2), dtype=jnp.float32)
    out2 = jax.block_until_ready(
        weighted_sum(weights, outputs2, min_kernel_elems=0, block_rows=16)
    )
    ref2 = weighted_sum_ref(weights, outputs2)
    assert out2.shape == (B2, H2)
    assert jnp.allclose(out2, ref2, atol=1e-5, rtol=1e-5), "mismatch vs reference (ragged)"

    # bf16 modality outputs: exercises the dtype-aware (16,128) sublane multiple.
    outputs3 = outputs_stacked.astype(jnp.bfloat16)
    out3 = jax.block_until_ready(weighted_sum(weights, outputs3, min_kernel_elems=0))
    ref3 = weighted_sum_ref(weights, outputs3)
    assert out3.dtype == jnp.bfloat16
    assert jnp.allclose(out3.astype(jnp.float32), ref3, atol=2e-2, rtol=2e-2), "mismatch (bf16)"

    # Tiny-input XLA fallback path (default threshold routes around the kernel).
    out4 = jax.block_until_ready(weighted_sum(weights, outputs_stacked))
    assert jnp.allclose(out4, ref, atol=1e-5, rtol=1e-5), "mismatch vs reference (fallback)"

    print("KERNEL_OK")
</pallas_src>

<mosaic_0001>
module attributes {stable_mosaic.version = 11 : i64} {
  func.func @_weighted_sum_kernel(%arg0: i32, %arg1: memref<3xf32, #tpu.memory_space<smem>>, %arg2: memref<3x16x128xf32, #tpu.memory_space<vmem>>, %arg3: memref<16x128xf32, #tpu.memory_space<vmem>>) attributes {dimension_semantics = [#tpu.dimension_semantics<parallel>], iteration_bounds = array<i64: 4>, scalar_prefetch = 0 : i64, scratch_operands = 0 : i64, tpu.core_type = #tpu.core_type<tc>, window_params = [{transform_indices = @transform_0, window_bounds = array<i64: 3>}, {transform_indices = @transform_1, window_bounds = array<i64: 3, 16, 128>}, {transform_indices = @transform_2, window_bounds = array<i64: 16, 128>}]} {
    %c0 = arith.constant 0 : index
    %c0_0 = arith.constant 0 : index
    %c0_1 = arith.constant 0 : index
    %0 = vector.load %arg2[%c0, %c0_0, %c0_1] : memref<3x16x128xf32, #tpu.memory_space<vmem>>, vector<1x16x128xf32>
    %1 = vector.shape_cast %0 : vector<1x16x128xf32> to vector<16x128xf32>
    %c0_2 = arith.constant 0 : index
    %2 = memref.load %arg1[%c0_2] : memref<3xf32, #tpu.memory_space<smem>>
    %3 = vector.broadcast %2 : f32 to vector<16x128xf32>
    %4 = arith.mulf %1, %3 : vector<16x128xf32>
    %c1 = arith.constant 1 : index
    %c0_3 = arith.constant 0 : index
    %c0_4 = arith.constant 0 : index
    %5 = vector.load %arg2[%c1, %c0_3, %c0_4] : memref<3x16x128xf32, #tpu.memory_space<vmem>>, vector<1x16x128xf32>
    %6 = vector.shape_cast %5 : vector<1x16x128xf32> to vector<16x128xf32>
    %c1_5 = arith.constant 1 : index
    %7 = memref.load %arg1[%c1_5] : memref<3xf32, #tpu.memory_space<smem>>
    %8 = vector.broadcast %7 : f32 to vector<16x128xf32>
    %9 = arith.mulf %6, %8 : vector<16x128xf32>
    %10 = arith.addf %4, %9 : vector<16x128xf32>
    %c2 = arith.constant 2 : index
    %c0_6 = arith.constant 0 : index
    %c0_7 = arith.constant 0 : index
    %11 = vector.load %arg2[%c2, %c0_6, %c0_7] : memref<3x16x128xf32, #tpu.memory_space<vmem>>, vector<1x16x128xf32>
    %12 = vector.shape_cast %11 : vector<1x16x128xf32> to vector<16x128xf32>
    %c2_8 = arith.constant 2 : index
    %13 = memref.load %arg1[%c2_8] : memref<3xf32, #tpu.memory_space<smem>>
    %14 = vector.broadcast %13 : f32 to vector<16x128xf32>
    %15 = arith.mulf %12, %14 : vector<16x128xf32>
    %16 = arith.addf %10, %15 : vector<16x128xf32>
    %c0_9 = arith.constant 0 : index
    %c0_10 = arith.constant 0 : index
    %17 = vector.load %arg3[%c0_9, %c0_10] : memref<16x128xf32, #tpu.memory_space<vmem>>, vector<16x128xf32>
    tpu.vector_store %arg3[%c0_9, %c0_10], %16 {strides = array<i32>} : memref<16x128xf32, #tpu.memory_space<vmem>>, vector<16x128xf32>,
    return
  }
  func.func @transform_0(%arg0: i32) -> i32 {
    %c0_i32 = arith.constant 0 : i32
    %c0_i32_0 = arith.constant 0 : i32
    return %c0_i32 : i32
  }
  func.func @transform_1(%arg0: i32) -> (i32, i32, i32) {
    %c0_i32 = arith.constant 0 : i32
    %c0_i32_0 = arith.constant 0 : i32
    %c0_i32_1 = arith.constant 0 : i32
    return %c0_i32, %arg0, %c0_i32_0 : i32, i32, i32
  }
  func.func @transform_2(%arg0: i32) -> (i32, i32) {
    %c0_i32 = arith.constant 0 : i32
    %c0_i32_0 = arith.constant 0 : i32
    return %arg0, %c0_i32 : i32, i32
  }
}

</mosaic_0001>

<bundles_post_ra>
// kernel: tpu_custom_call.1
= control target key start
LH: loop header
LB: loop body
LE: loop exit
PB: predicated region body
PF: predicated region fallthrough
CT: control target
= control target key end

     0   :  { %7 = vsyncpa [#allocation5], 0  ;;  %s677_s0 = inlined_call_operand.hbm [shape: f32[3], index: 0, kind: input, shape index: {}]   ;;  %s678_s1 = inlined_call_operand.hbm [shape: f32[3,64,128], index: 1, kind: input, shape index: {}]   ;;  %s679_s2 = inlined_call_operand.hbm [shape: f32[64,128], index: 2, kind: output, shape index: {}]  }
   0x1   :  { %8 = vsyncpa [#allocation3], 0 }
   0x2   :  { %10 = vsyncpa [#allocation3 + $0x1], 0 }
   0x3   :  { %11 = vsyncpa [#allocation4], 0 }
   0x4   :  { %13 = vsyncpa [#allocation4 + $0x1], 0  ;;  %s536_s9 = smov 0   ;;  %s538_s10 = smov 0  }
   0x5   :  { %s540_s11 = smov 0   ;;  %s542_s12 = smov 0  }
   0x6 LB: > { %s557_s13 = sadd.s32 4294967295, %s510_s12   ;;  %s332_s14 = sadd.s32 4294967294, %s510_s12   ;;  %s510_s12 = sphi %s542_s12, %s688_s12   ;;  %s506_s11 = sphi %s540_s11, %s687_s11   ;;  %s502_s10 = sphi %s538_s10, %s686_s10   ;;  %s498_s9 = sphi %s536_s9, %s685_s9  }
   0x7   : > { %s561_s15 = sadd.s32 1, %s510_s12   ;;  %s47_s16 = sadd.s32 1, %s506_s11 }
   0x8   : > { %s44_s17 = ssub.s32 %s510_s12, %s561_s15  ;;  %p54_p0 = scmp.ne.s32.totalorder %s506_s11, %s502_s10 }
   0x9   : > { %p45_p1 = scmp.eq.s32.totalorder %s44_s17, 0  ;;  %p55_p2 = scmp.eq.s32.totalorder %s510_s12, 0 }
   0xa   : > { %p60_p3 = scmp.ne.s32.totalorder %s502_s10, %s498_s9  ;;  %p61_p4 = scmp.eq.s32.totalorder %s557_s13, 0 }
   0xb   : > { %s573_s18 = scalar_select %p45_p1, %s506_s11, %s47_s16  }
   0xc   : > { %p575_p5 = por %p55_p2, %p54_p0  ;;  %p581_p6 = por %p61_p4, %p60_p3 }
   0xd   : > { %p84_p7 = scmp.eq.s32.totalorder %s557_s13, 3  ;;  %p90_p8 = scmp.eq.s32.totalorder %s332_s14, 3 }
   0xe   : > { %p333_p9 = scmp.ge.s32.totalorder %s510_s12, 1  ;;  %p97_p10 = scmp.lt.s32.totalorder %s510_s12, 5 }
   0xf   : > { %p588_p11 = por %p84_p7, %p54_p0  ;;  %p592_p12 = por %p90_p8, %p60_p3 }
  0x10   : > { %p596_p13 = pnand %p333_p9, %p97_p10  ;;  %s109_s26 = sshll.u32 %s677_s0, 4  ;;  %s110_s26 = int_to_ptr.hbm [resolvable:$true] %s109_s26 }
  0x11   : > { %s512_s27 = smov [#allocation2]   ;;  %p335_p2 = scmp.ge.s32.totalorder %s510_s12, 4 }
  0x12   : > { %p373_p1 = pneg %p596_p13 }
  0x13   : > { %116 = sbr.rel (%p335_p2) target bundleno = 38 (0x26), region = 20 }
  0x14   : > { %p374_p0 = pnand %p373_p1, %p61_p4 }
  0x16   : > { %376 = dma.hbm_to_smem (!%p374_p0), %s110_s26, 16, %s512_s27, [#allocation5]  }
  0x18   : > { %s120_s28 = sand.u32 1, %s506_s11   ;;  %s354_s29 = sshll.u32 %s510_s12, 4 }
  0x19   : > { %s356_s30 = smul.u32 48, %s120_s28  ;;  %s129_s5 = scalar_lea.hbm %s678_s1, %s354_s29 }
  0x1a   : > { %s142_s6 = sshll.u32 %s129_s5, 4  ;;  %s513_s17 = smov 1024   ;;  %s143_s6 = int_to_ptr.hbm [resolvable:$true] %s142_s6 }
  0x1b   : > { %s360_s7 = scalar_select %p575_p5, [#allocation0], [#allocation10] }
  0x1c   : > { %s124_s8 = scalar_lea.vmem [#allocation6], %s356_s30  ;;  %361 = sst [smem:[#allocation9]] (%p575_p5), %s513_s17 }
  0x1d   : > { %s144_s14 = sshll.u32 %s124_s8, 4  ;;  %s134_s16 = sld [smem:[%s360_s7]]   ;;  %s145_s14 = int_to_ptr.vmem [resolvable:$true] %s144_s14 }
  0x1e   : > { %s514_s24 = smov 256   ;;  %s515_s25 = smov 2  }
  0x1f   : > { %362 = sst [smem:[#allocation9 + $0x1]] (%p575_p5), %s514_s24  ;;  %s516_s26 = smov 128  }
  0x20   : > { %363 = sst [smem:[#allocation9 + $0x2]] (%p575_p5), %s515_s25  ;;  %s517_s29 = smov 8  }
  0x21   : > { %364 = sst [smem:[#allocation9 + $0x3]] (%p575_p5), %s516_s26  ;;  %s121_s3 = scalar_lea.sflag [#allocation3], %s120_s28 }
  0x22   : > { %365 = sst [smem:[#allocation9 + $0x4]] (%p575_p5), %s516_s26  ;;  %s518_s4 = smov [#allocation8]  }
  0x23   : > { %s338_s27 = sshll.u32 %s134_s16, 26  ;;  %366 = sst [smem:[#allocation9 + $0x5]] (%p575_p5), %s517_s29 }
  0x24   : > { %s339_s30 = sadd.s32 134217728, %s338_s27 }
  0x25   : > { %367 = dma.general (%p575_p5), %s143_s6, 768, %s145_s14, %s121_s3, %s518_s4, [#allocation9], %s339_s30, 0  }
  0x26 PF: > { %169 = sbr.rel (%p596_p13) target bundleno = 70 (0x46), region = 28 }
  0x2b   : > { %485 = dma.done.wait (%p61_p4), [#allocation5], 16  }
  0x2c   : > { %487 = vsyncadd (%p61_p4), [#allocation5], 4294967280  ;;  %s636_s5 = sand.u32 1, %s502_s10  }
  0x2d   : > { %s357_s28 = smul.u32 48, %s636_s5  ;;  %s177_s7 = scalar_lea.sflag [#allocation3], %s636_s5 }
  0x2f   : > { %s180_s19 = scalar_lea.vmem [#allocation6], %s357_s28 }
  0x30   : > { %489 = dma.done.wait (%p581_p6), %s177_s7, 768  }
  0x31   : > { %491 = vsyncadd (%p581_p6), %s177_s7, 4294966528 }
  0x32   : > { %186 = sfence }
  0x33   : > { %s207_s23 = sld [smem:[#allocation2]]  ;;  %s342_s8 = sshll.u32 %s636_s5, 4  ;;  %v205_v0 = vld [vmem:[%s180_s19] sm:$0xff]  ;;  %v206_v1 = vld [vmem:[%s180_s19 + $0x8] sm:$0xff]  ;;  %v343_v2 = vld [vmem:[%s180_s19 + $0x10] sm:$0xff] }
  0x34   : > { %s345_s6 = sld [smem:[#allocation2 + $0x1]]  ;;  %s355_s16 = sshll.u32 %s557_s13, 4  ;;  %v344_v3 = vld [vmem:[%s180_s19 + $0x18] sm:$0xff]  ;;  %v346_v5 = vld [vmem:[%s180_s19 + $0x20] sm:$0xff]  ;;  %v347_v6 = vld [vmem:[%s180_s19 + $0x28] sm:$0xff] }
  0x35   : > { %s348_s14 = sld [smem:[#allocation2 + $0x2]]  ;;  %s243_s24 = scalar_lea.hbm %s679_s2, %s355_s16 }
  0x36   : > { %s202_s25 = scalar_lea.vmem [#allocation7], %s342_s8  ;;  %s246_s13 = sshll.u32 %s243_s24, 4  ;;  %s247_s13 = int_to_ptr.hbm [resolvable:$true] %s246_s13 }
  0x37   : > { %s244_s26 = sshll.u32 %s202_s25, 4  ;;  %s232_s27 = scalar_lea.sflag [#allocation4], %s636_s5  ;;  %s245_s26 = int_to_ptr.vmem [resolvable:$true] %s244_s26 }
  0x38   : > { %s454_s29 = sshra.s32 %s247_s13, 4  ;;  %s460_s28 = scalar_lea.hbm %s679_s2, 64  ;;  %s455_s29 = int_to_ptr.hbm [resolvable:$true] %s454_s29 }
  0x39   : > { %v208_v4 = vstv %s207_s23  ;;  %s456_s30 = scalar_lea.hbm %s455_s29, 16  ;;  %p461_p6 = scmp.lt.s32.totalorder %s455_s29, %s679_s2 }
  0x3a   : > { %v209_v7 = vmul.f32 %v208_v4, %v205_v0  ;;  %v215_v8 = vstv %s345_s6  ;;  %v210_v9 = vmul.f32 %v208_v4, %v206_v1  ;;  %p457_p3 = scmp.ne.s32.totalorder %s455_s29, %s456_s30  ;;  %p462_p7 = scmp.lt.s32.totalorder %s460_s28, %s456_s30 }
  0x3b   : > { %v216_v10 = vmul.f32 %v343_v2, %v215_v8  ;;  %v224_v11 = vstv %s348_s14  ;;  %v217_v12 = vmul.f32 %v344_v3, %v215_v8 }
  0x3c   : > { %v225_v13 = vmul.f32 %v346_v5, %v224_v11  ;;  %v226_v14 = vmul.f32 %v347_v6, %v224_v11  ;;  %p458_p4 = pnand %p457_p3, %p588_p11  ;;  %p463_p8 = por %p462_p7, %p461_p6 }
  0x3d   : > { %v218_v15 = vadd.f32 %v216_v10, %v209_v7  ;;  %v219_v16 = vadd.f32 %v217_v12, %v210_v9 }
  0x3e   : > { %p459_p5 = pneg %p458_p4 }
  0x3f   : > { %v227_v17 = vadd.f32 %v225_v13, %v218_v15  ;;  %v228_v18 = vadd.f32 %v226_v14, %v219_v16 }
  0x40   : > { %p464_p9 = pnand %p463_p8, %p459_p5 }
  0x41   : > { %229 = vst [vmem:[%s202_s25] sm:$0xff] %v227_v17 }
  0x42   : > { %230 = vst [vmem:[%s202_s25 + $0x8] sm:$0xff] %v228_v18 }
  0x43   : > { %467 = shalt.err (!%p464_p9)
}
  0x44   : > { %s519_s5 = smov 128   ;;  %s520_s23 = smov 8  }
  0x45   : > { %371 = dma.vmem_to_hbm [thread:$0]  (%p588_p11), %s245_s26, 256, %s247_s13, %s232_s27, %s519_s5, %s519_s5, %s520_s23  }
  0x46 PF: > { %p383_p10 = scmp.ge.s32.totalorder %s510_s12, 2  ;;  %s261_s6 = sand.u32 1, %s498_s9  }
  0x47   : > { %s262_s8 = scalar_lea.sflag [#allocation4], %s261_s6 }
  0x48   : > { %p378_p13 = pnand %p383_p10, %p592_p12 }
  0x4a   : > { %p379_p1 = pneg %p378_p13 }
  0x4c   : > { %493 = dma.done.wait (%p379_p1), %s262_s8, 256  }
  0x4d   : > { %495 = vsyncadd (%p379_p1), %s262_s8, 4294967040  ;;  %p16_p0 = scmp.ge.s32.totalorder %s561_s15, 6   ;;  %s685_s9 = smov %s502_s10 }
  0x4e   : > { %s686_s10 = smov %s506_s11  ;;  %s687_s11 = smov %s573_s18 }
  0x4f   : > { %s688_s12 = smov %s561_s15  ;;  %18 = sbr.rel (!%p16_p0) target bundleno = 6 (0x6), region = 85 }
  0x54   :  { %268 = vsyncpa [#allocation3], 1 }
  0x55   :  { %270 = vsyncpa [#allocation3 + $0x1], 1 }
  0x56   :  { %271 = vsyncpa [#allocation4], 1 }
  0x57   :  { %273 = vsyncpa [#allocation4 + $0x1], 1 }
  0x58   :  { %274 = vsyncpa [#allocation5], 1 }
  0x59   :  { %276 = vsyncpa [#allocation5 + $0x1], 1 }

</bundles_post_ra>
